<compile_context>
chip_gen: v7x
topology: tpu7x:2x2x1
jax: 0.10.0
libtpu: 0.0.40
codegen_flags: <defaults>
</compile_context>

<pallas_src>
import jax
import jax.numpy as jnp
from jax.experimental import pallas as pl
from jax.experimental.pallas import tpu as pltpu
import numpy as np


def _round_up(x, m):
    return ((x + m - 1) // m) * m


def actor_kernel(x_ref, w1_ref, b1_ref, w2_ref, b2_ref, w3_ref, b3_ref, o_ref):
    # MXU operand dtype follows the weights (bf16 by default); accumulate in f32.
    cdt = w1_ref.dtype
    x = x_ref[...].astype(cdt)

    # fc1 + ReLU (bias/ReLU in f32)
    h1 = jnp.dot(x, w1_ref[...], preferred_element_type=jnp.float32)
    h1 = jnp.maximum(h1 + b1_ref[...], 0.0)

    # fc2 + ReLU
    h2 = jnp.dot(h1.astype(cdt), w2_ref[...], preferred_element_type=jnp.float32)
    h2 = jnp.maximum(h2 + b2_ref[...], 0.0)

    # fc3 + tanh (padded action columns have zero weight/bias -> tanh(0)=0, sliced in wrapper)
    h3 = jnp.dot(h2.astype(cdt), w3_ref[...], preferred_element_type=jnp.float32)
    o_ref[...] = jnp.tanh(h3 + b3_ref[...]).astype(o_ref.dtype)


def prepare_actor_params(params, *, mxu_dtype=jnp.bfloat16):
    """One-time parameter prep (hoisted out of the per-call hot path).

    Casts weights to the MXU dtype, keeps biases in f32, and zero-pads the action
    dimension of fc3 to a lane-dense 128 columns.
    """
    w1, b1 = params["w1"], params["b1"]
    w2, b2 = params["w2"], params["b2"]
    w3, b3 = params["w3"], params["b3"]
    A = w3.shape[1]
    A_pad = _round_up(A, 128)  # exactly 128 for small action dims; never over-pad to 256
    return {
        "w1": jnp.asarray(w1, mxu_dtype),
        "b1": jnp.asarray(b1, jnp.float32),
        "w2": jnp.asarray(w2, mxu_dtype),
        "b2": jnp.asarray(b2, jnp.float32),
        "w3": jnp.pad(jnp.asarray(w3, jnp.float32),
                      ((0, 0), (0, A_pad - A))).astype(mxu_dtype),
        "b3": jnp.pad(jnp.asarray(b3, jnp.float32), ((0, 0), (0, A_pad - A))),
        "action_size": A,
    }


def actor_forward(state, prepared, *, batch_tile=512, out_dtype=jnp.bfloat16):
    """Full Actor forward pass inside one Pallas kernel.

    state:    (B, state_size) float32
    prepared: output of prepare_actor_params()
    Returns:  (B, action_size) float32
    """
    w1, b1 = prepared["w1"], prepared["b1"]
    w2, b2 = prepared["w2"], prepared["b2"]
    w3, b3 = prepared["w3"], prepared["b3"]
    A = prepared["action_size"]

    B, S = state.shape
    F1 = w1.shape[1]
    F2 = w2.shape[1]
    A_pad = w3.shape[1]

    # --- batch tiling ---
    # Large tile to amortize the ~0.35 us per-grid-step overhead, with:
    #   * >= 2 grid steps whenever B >= 256 so v7x's two TensorCores both get work,
    #   * tile = round_up(ceil(B / n_tiles), 8) so ragged batches pad < 8 rows/tile.
    n_tiles = max(pl.cdiv(B, batch_tile), 2 if B >= 256 else 1)
    tile = _round_up(pl.cdiv(B, n_tiles), 8)
    B_pad = tile * n_tiles
    if B_pad != B:
        state = jnp.pad(state, ((0, B_pad - B), (0, 0)))
    grid = (n_tiles,)

    mxu_itemsize = jnp.dtype(w1.dtype).itemsize
    out_itemsize = jnp.dtype(out_dtype).itemsize

    flops = 2 * B_pad * (S * F1 + F1 * F2 + F2 * A_pad)
    bytes_accessed = int(
        B_pad * S * state.dtype.itemsize
        + mxu_itemsize * (S * F1 + F1 * F2 + F2 * A_pad)
        + 4 * (F1 + F2 + A_pad)
        + B_pad * A_pad * out_itemsize
    )

    # Per-step VMEM footprint estimate (double-buffered IO tiles + weights + f32
    # intermediates + bf16 MXU copies). Only raise the scoped limit when it matters
    # (v5e default is 16 MiB); small tiles stay on the compiler default.
    vmem_est = (
        2 * tile * S * 4
        + 2 * tile * A_pad * out_itemsize
        + 2 * mxu_itemsize * (S * F1 + F1 * F2 + F2 * A_pad)
        + 2 * 4 * (F1 + F2 + A_pad)
        + 4 * tile * (F1 + F2 + A_pad)
        + mxu_itemsize * tile * (S + F1 + F2)
    )
    compiler_kwargs = dict(dimension_semantics=("parallel",))
    if vmem_est > 12 * 1024 * 1024:
        compiler_kwargs["vmem_limit_bytes"] = int(min(2 * vmem_est, 64 * 1024 * 1024))

    out = pl.pallas_call(
        actor_kernel,
        out_shape=jax.ShapeDtypeStruct((B_pad, A_pad), out_dtype),
        grid_spec=pltpu.PrefetchScalarGridSpec(
            num_scalar_prefetch=0,
            grid=grid,
            in_specs=[
                # state is tiled over batch; weights/biases are full blocks with
                # constant index maps -> resident in VMEM, reused every grid step.
                pl.BlockSpec((tile, S), lambda i: (i, 0)),
                pl.BlockSpec((S, F1), lambda i: (0, 0)),
                pl.BlockSpec((1, F1), lambda i: (0, 0)),
                pl.BlockSpec((F1, F2), lambda i: (0, 0)),
                pl.BlockSpec((1, F2), lambda i: (0, 0)),
                pl.BlockSpec((F2, A_pad), lambda i: (0, 0)),
                pl.BlockSpec((1, A_pad), lambda i: (0, 0)),
            ],
            out_specs=pl.BlockSpec((tile, A_pad), lambda i: (i, 0)),
        ),
        compiler_params=pltpu.CompilerParams(**compiler_kwargs),
        cost_estimate=pl.CostEstimate(
            flops=flops,
            transcendentals=B_pad * A_pad,
            bytes_accessed=bytes_accessed,
        ),
    )(state, w1, b1, w2, b2, w3, b3)

    out = out[:B, :A]
    if out.dtype != jnp.float32:
        out = out.astype(jnp.float32)  # widen after the slice; writeback stayed bf16
    return out


def init_actor_params(key, state_size, action_size, fc1_units=512, fc2_units=256):
    """Deterministic init mirroring the PyTorch module's reset_parameters().

    Note: hidden_init() in the reference uses layer.weight.size()[0], which for
    nn.Linear is out_features; we reproduce that exactly. Biases follow the
    PyTorch Linear default U(-1/sqrt(in_features), 1/sqrt(in_features)).
    """
    ks = jax.random.split(key, 6)

    def u(k, shape, lim):
        return jax.random.uniform(k, shape, jnp.float32, minval=-lim, maxval=lim)

    # weights stored as (in, out)
    lim1 = 1.0 / np.sqrt(fc1_units)   # hidden_init fan = weight.size()[0] = out_features
    lim2 = 1.0 / np.sqrt(fc2_units)
    lim3 = 0.003
    w1 = u(ks[0], (state_size, fc1_units), lim1)
    w2 = u(ks[1], (fc1_units, fc2_units), lim2)
    w3 = u(ks[2], (fc2_units, action_size), lim3)
    # default PyTorch Linear bias init (untouched by reset_parameters)
    b1 = u(ks[3], (1, fc1_units), 1.0 / np.sqrt(state_size))
    b2 = u(ks[4], (1, fc2_units), 1.0 / np.sqrt(fc1_units))
    b3 = u(ks[5], (1, action_size), 1.0 / np.sqrt(fc2_units))
    return {"w1": w1, "b1": b1, "w2": w2, "b2": b2, "w3": w3, "b3": b3}


def actor_forward_ref(state, p):
    h1 = jnp.maximum(state @ p["w1"] + p["b1"], 0.0)
    h2 = jnp.maximum(h1 @ p["w2"] + p["b2"], 0.0)
    return jnp.tanh(h2 @ p["w3"] + p["b3"])


if __name__ == "__main__":
    key = jax.random.PRNGKey(0)
    k_param, k_state1, k_state2, k_state3 = jax.random.split(key, 4)

    state_size = 32
    action_size = 4

    params = init_actor_params(k_param, state_size, action_size,
                               fc1_units=512, fc2_units=256)

    # One-time parameter prep (hoisted out of the per-call hot path).
    prepared_f32 = prepare_actor_params(params, mxu_dtype=jnp.float32)
    prepared_bf16 = prepare_actor_params(params, mxu_dtype=jnp.bfloat16)

    # Case 1: small batch (single tile), exact f32 MXU + f32 output path.
    state_small = jax.random.normal(k_state1, (8, state_size), dtype=jnp.float32)
    out_f32 = jax.block_until_ready(
        actor_forward(state_small, prepared_f32, out_dtype=jnp.float32))
    ref_small = jax.block_until_ready(actor_forward_ref(state_small, params))
    np.testing.assert_allclose(np.asarray(out_f32), np.asarray(ref_small),
                               rtol=1e-5, atol=1e-5)

    # Case 2: ragged batch B=200 -> single 200-row tile (no padded rows),
    # bf16 MXU operands + bf16 writeback with f32 accumulation -> relaxed tolerance.
    state_mid = jax.random.normal(k_state2, (200, state_size), dtype=jnp.float32)
    out_mid = jax.block_until_ready(actor_forward(state_mid, prepared_bf16))
    ref_mid = jax.block_until_ready(actor_forward_ref(state_mid, params))
    assert out_mid.shape == (200, action_size)
    np.testing.assert_allclose(np.asarray(out_mid), np.asarray(ref_mid),
                               rtol=5e-2, atol=2e-2)

    # Case 3: B=520 with batch_tile=256 -> 3 "parallel" tiles of 176 rows
    # (>=2 tiles keeps both v7x TensorCores busy; <8 padded rows of waste).
    state_big = jax.random.normal(k_state3, (520, state_size), dtype=jnp.float32)
    out_big = jax.block_until_ready(
        actor_forward(state_big, prepared_bf16, batch_tile=256))
    ref_big = jax.block_until_ready(actor_forward_ref(state_big, params))
    assert out_big.shape == (520, action_size)
    np.testing.assert_allclose(np.asarray(out_big), np.asarray(ref_big),
                               rtol=5e-2, atol=2e-2)

    print("KERNEL_OK")
</pallas_src>

<mosaic_0001>
module attributes {stable_mosaic.version = 11 : i64} {
  func.func @actor_kernel(%arg0: i32, %arg1: memref<8x32xf32, #tpu.memory_space<vmem>>, %arg2: memref<32x512xf32, #tpu.memory_space<vmem>>, %arg3: memref<1x512xf32, #tpu.memory_space<vmem>>, %arg4: memref<512x256xf32, #tpu.memory_space<vmem>>, %arg5: memref<1x256xf32, #tpu.memory_space<vmem>>, %arg6: memref<256x128xf32, #tpu.memory_space<vmem>>, %arg7: memref<1x128xf32, #tpu.memory_space<vmem>>, %arg8: memref<8x128xf32, #tpu.memory_space<vmem>>) attributes {dimension_semantics = [#tpu.dimension_semantics<parallel>], iteration_bounds = array<i64: 1>, scalar_prefetch = 0 : i64, scratch_operands = 0 : i64, tpu.core_type = #tpu.core_type<tc>, window_params = [{transform_indices = @transform_0, window_bounds = array<i64: 8, 32>}, {pipeline_mode = #tpu.pipeline_mode<synchronous>, transform_indices = @transform_1, window_bounds = array<i64: 32, 512>}, {pipeline_mode = #tpu.pipeline_mode<synchronous>, transform_indices = @transform_2, window_bounds = array<i64: 1, 512>}, {pipeline_mode = #tpu.pipeline_mode<synchronous>, transform_indices = @transform_3, window_bounds = array<i64: 512, 256>}, {pipeline_mode = #tpu.pipeline_mode<synchronous>, transform_indices = @transform_4, window_bounds = array<i64: 1, 256>}, {pipeline_mode = #tpu.pipeline_mode<synchronous>, transform_indices = @transform_5, window_bounds = array<i64: 256, 128>}, {pipeline_mode = #tpu.pipeline_mode<synchronous>, transform_indices = @transform_6, window_bounds = array<i64: 1, 128>}, {transform_indices = @transform_7, window_bounds = array<i64: 8, 128>}]} {
    %c0 = arith.constant 0 : index
    %c0_0 = arith.constant 0 : index
    %0 = vector.load %arg1[%c0, %c0_0] : memref<8x32xf32, #tpu.memory_space<vmem>>, vector<8x32xf32>
    %c0_1 = arith.constant 0 : index
    %c0_2 = arith.constant 0 : index
    %1 = vector.load %arg2[%c0_1, %c0_2] : memref<32x512xf32, #tpu.memory_space<vmem>>, vector<32x512xf32>
    %cst = arith.constant dense<0.000000e+00> : vector<8x512xf32>
    %2 = tpu.matmul %0, %1, %cst {dimension_numbers = #tpu.dot_dimension_numbers<[1], [0], [0], [1], [0, 0, 1, 1], [], []>} : vector<8x32xf32>, vector<32x512xf32>, vector<8x512xf32> -> vector<8x512xf32>
    %c0_3 = arith.constant 0 : index
    %c0_4 = arith.constant 0 : index
    %3 = vector.load %arg3[%c0_3, %c0_4] : memref<1x512xf32, #tpu.memory_space<vmem>>, vector<1x512xf32>
    %4 = vector.broadcast %3 : vector<1x512xf32> to vector<8x512xf32>
    %5 = arith.addf %2, %4 : vector<8x512xf32>
    %cst_5 = arith.constant 0.000000e+00 : f32
    %6 = vector.broadcast %cst_5 : f32 to vector<8x512xf32>
    %7 = arith.maximumf %5, %6 : vector<8x512xf32>
    %c0_6 = arith.constant 0 : index
    %c0_7 = arith.constant 0 : index
    %8 = vector.load %arg4[%c0_6, %c0_7] : memref<512x256xf32, #tpu.memory_space<vmem>>, vector<512x256xf32>
    %cst_8 = arith.constant dense<0.000000e+00> : vector<8x256xf32>
    %9 = tpu.matmul %7, %8, %cst_8 {dimension_numbers = #tpu.dot_dimension_numbers<[1], [0], [0], [1], [0, 0, 1, 1], [], []>} : vector<8x512xf32>, vector<512x256xf32>, vector<8x256xf32> -> vector<8x256xf32>
    %c0_9 = arith.constant 0 : index
    %c0_10 = arith.constant 0 : index
    %10 = vector.load %arg5[%c0_9, %c0_10] : memref<1x256xf32, #tpu.memory_space<vmem>>, vector<1x256xf32>
    %11 = vector.broadcast %10 : vector<1x256xf32> to vector<8x256xf32>
    %12 = arith.addf %9, %11 : vector<8x256xf32>
    %cst_11 = arith.constant 0.000000e+00 : f32
    %13 = vector.broadcast %cst_11 : f32 to vector<8x256xf32>
    %14 = arith.maximumf %12, %13 : vector<8x256xf32>
    %c0_12 = arith.constant 0 : index
    %c0_13 = arith.constant 0 : index
    %15 = vector.load %arg6[%c0_12, %c0_13] : memref<256x128xf32, #tpu.memory_space<vmem>>, vector<256x128xf32>
    %cst_14 = arith.constant dense<0.000000e+00> : vector<8x128xf32>
    %16 = tpu.matmul %14, %15, %cst_14 {dimension_numbers = #tpu.dot_dimension_numbers<[1], [0], [0], [1], [0, 0, 1, 1], [], []>} : vector<8x256xf32>, vector<256x128xf32>, vector<8x128xf32> -> vector<8x128xf32>
    %c0_15 = arith.constant 0 : index
    %c0_16 = arith.constant 0 : index
    %17 = vector.load %arg7[%c0_15, %c0_16] : memref<1x128xf32, #tpu.memory_space<vmem>>, vector<1x128xf32>
    %18 = vector.broadcast %17 : vector<1x128xf32> to vector<8x128xf32>
    %19 = arith.addf %16, %18 : vector<8x128xf32>
    %20 = math.tanh %19 : vector<8x128xf32>
    %c0_17 = arith.constant 0 : index
    %c0_18 = arith.constant 0 : index
    %21 = vector.load %arg8[%c0_17, %c0_18] : memref<8x128xf32, #tpu.memory_space<vmem>>, vector<8x128xf32>
    tpu.vector_store %arg8[%c0_17, %c0_18], %20 {strides = array<i32>} : memref<8x128xf32, #tpu.memory_space<vmem>>, vector<8x128xf32>,
    return
  }
  func.func @transform_0(%arg0: i32) -> (i32, i32) {
    %c0_i32 = arith.constant 0 : i32
    %c0_i32_0 = arith.constant 0 : i32
    return %arg0, %c0_i32 : i32, i32
  }
  func.func @transform_1(%arg0: i32) -> (i32, i32) {
    %c0_i32 = arith.constant 0 : i32
    %c0_i32_0 = arith.constant 0 : i32
    %c0_i32_1 = arith.constant 0 : i32
    return %c0_i32, %c0_i32_0 : i32, i32
  }
  func.func @transform_2(%arg0: i32) -> (i32, i32) {
    %c0_i32 = arith.constant 0 : i32
    %c0_i32_0 = arith.constant 0 : i32
    %c0_i32_1 = arith.constant 0 : i32
    return %c0_i32, %c0_i32_0 : i32, i32
  }
  func.func @transform_3(%arg0: i32) -> (i32, i32) {
    %c0_i32 = arith.constant 0 : i32
    %c0_i32_0 = arith.constant 0 : i32
    %c0_i32_1 = arith.constant 0 : i32
    return %c0_i32, %c0_i32_0 : i32, i32
  }
  func.func @transform_4(%arg0: i32) -> (i32, i32) {
    %c0_i32 = arith.constant 0 : i32
    %c0_i32_0 = arith.constant 0 : i32
    %c0_i32_1 = arith.constant 0 : i32
    return %c0_i32, %c0_i32_0 : i32, i32
  }
  func.func @transform_5(%arg0: i32) -> (i32, i32) {
    %c0_i32 = arith.constant 0 : i32
    %c0_i32_0 = arith.constant 0 : i32
    %c0_i32_1 = arith.constant 0 : i32
    return %c0_i32, %c0_i32_0 : i32, i32
  }
  func.func @transform_6(%arg0: i32) -> (i32, i32) {
    %c0_i32 = arith.constant 0 : i32
    %c0_i32_0 = arith.constant 0 : i32
    %c0_i32_1 = arith.constant 0 : i32
    return %c0_i32, %c0_i32_0 : i32, i32
  }
  func.func @transform_7(%arg0: i32) -> (i32, i32) {
    %c0_i32 = arith.constant 0 : i32
    %c0_i32_0 = arith.constant 0 : i32
    return %arg0, %c0_i32 : i32, i32
  }
}

</mosaic_0001>

<bundles_post_ra>
// kernel: tpu_custom_call.1
= control target key start
LH: loop header
LB: loop body
LE: loop exit
PB: predicated region body
PF: predicated region fallthrough
CT: control target
= control target key end

     0   :  { %12 = vsyncpa [#allocation3], 0  ;;  %s1168_s0 = inlined_call_operand.hbm [shape: f32[8,32], index: 0, kind: input, shape index: {}]   ;;  %s1169_s1 = inlined_call_operand.hbm [shape: f32[32,512], index: 1, kind: input, shape index: {}]   ;;  %s1170_s2 = inlined_call_operand.vmem [shape: f32[1,512], index: 2, kind: input, shape index: {}]   ;;  %s1171_s3 = inlined_call_operand.hbm [shape: f32[512,256], index: 3, kind: input, shape index: {}]   ;;  %s1172_s4 = inlined_call_operand.vmem [shape: f32[1,256], index: 4, kind: input, shape index: {}]   ;;  %s1173_s5 = inlined_call_operand.hbm [shape: f32[256,128], index: 5, kind: input, shape index: {}]   ;;  %s1174_s6 = inlined_call_operand.vmem [shape: f32[1,128], index: 6, kind: input, shape index: {}]   ;;  %s1175_s7 = inlined_call_operand.hbm [shape: f32[8,128], index: 7, kind: output, shape index: {}]  }
   0x1   :  { %13 = vsyncpa [#allocation6], 0 }
   0x2   :  { %14 = vsyncpa [#allocation9], 0 }
   0x3   :  { %15 = vsyncpa [#allocation4], 0  ;;  %s1031_s24 = smov [#allocation5]   ;;  %s913_s28 = scalar_lea.hbm %s1169_s1, 2048 }
   0x4   :  { %s31_s25 = sshll.u32 %s1031_s24, 4  ;;  %p914_p0 = scmp.ne.s32.totalorder %s1169_s1, %s913_s28  ;;  %s32_s25 = int_to_ptr.vmem [resolvable:$true] %s31_s25 }
   0x5   :  { %p917_p1 = scmp.lt.u32.totalorder %s913_s28, %s1169_s1 }
   0x7   :  { %p919_p2 = pnand %p917_p1, %p914_p0 }
   0x9   :  { %922 = shalt.err (!%p919_p2)
}
   0xa   :  { %s923_s10 = scalar_lea.vmem %s32_s25, 2048  ;;  %p928_p4 = scmp.lt.s32.totalorder %s32_s25, %s32_s25 }
   0xb   :  { %p924_p3 = scmp.ne.s32.totalorder %s32_s25, %s923_s10  ;;  %p929_p5 = scmp.lt.s32.totalorder %s923_s10, %s923_s10 }
   0xd   :  { %p930_p6 = por %p929_p5, %p928_p4 }
   0xf   :  { %p931_p7 = pnand %p930_p6, %p924_p3 }
  0x11   :  { %934 = shalt.err (!%p931_p7)
}
  0x12   :  { %s1032_s11 = smov 512   ;;  %s1033_s12 = smov 32  }
  0x13   :  { %37 = dma.hbm_to_vmem [thread:$0]  %s1169_s1, 2048, %s32_s25, [#allocation6], %s1032_s11, %s1032_s11, %s1033_s12  }
  0x14   :  { %s1034_s15 = smov [#allocation2]   ;;  %s1035_s17 = smov [#allocation7]  }
  0x15   :  { %s22_s16 = sshll.u32 %s1034_s15, 4  ;;  %s45_s18 = sshll.u32 %s1035_s17, 4  ;;  %s23_s16 = int_to_ptr.vmem [resolvable:$true] %s22_s16  ;;  %s46_s18 = int_to_ptr.vmem [resolvable:$true] %s45_s18 }
  0x16   :  { %s935_s21 = scalar_lea.hbm %s1168_s0, 128 }
  0x17   :  { %p936_p8 = scmp.ne.s32.totalorder %s1168_s0, %s935_s21  ;;  %p939_p9 = scmp.lt.u32.totalorder %s935_s21, %s1168_s0 }
  0x19   :  { %p941_p10 = pnand %p939_p9, %p936_p8 }
  0x1b   :  { %944 = shalt.err (!%p941_p10)
}
  0x1c   :  { %s945_s1 = scalar_lea.vmem %s23_s16, 128  ;;  %p950_p12 = scmp.lt.s32.totalorder %s23_s16, %s23_s16 }
  0x1d   :  { %p946_p11 = scmp.ne.s32.totalorder %s23_s16, %s945_s1  ;;  %p951_p13 = scmp.lt.s32.totalorder %s945_s1, %s945_s1 }
  0x1f   :  { %p952_p0 = por %p951_p13, %p950_p12 }
  0x21   :  { %p953_p1 = pnand %p952_p0, %p946_p11 }
  0x23   :  { %956 = shalt.err (!%p953_p1)
}
  0x24   :  { %25 = dma.hbm_to_vmem [thread:$0]  %s1168_s0, 128, %s23_s16, [#allocation3]  }
  0x25   :  { %s957_s30 = scalar_lea.hbm %s1171_s3, 16384 }
  0x26   :  { %p958_p2 = scmp.ne.s32.totalorder %s1171_s3, %s957_s30  ;;  %p961_p3 = scmp.lt.u32.totalorder %s957_s30, %s1171_s3 }
  0x28   :  { %p963_p4 = pnand %p961_p3, %p958_p2 }
  0x2a   :  { %966 = shalt.err (!%p963_p4)
}
  0x2b   :  { %s967_s12 = scalar_lea.vmem %s46_s18, 16384  ;;  %p972_p6 = scmp.lt.s32.totalorder %s46_s18, %s46_s18 }
  0x2c   :  { %p968_p5 = scmp.ne.s32.totalorder %s46_s18, %s967_s12  ;;  %p973_p7 = scmp.lt.s32.totalorder %s967_s12, %s967_s12 }
  0x2e   :  { %p974_p8 = por %p973_p7, %p972_p6 }
  0x30   :  { %p975_p9 = pnand %p974_p8, %p968_p5 }
  0x32   :  { %978 = shalt.err (!%p975_p9)
}
  0x33   :  { %s1036_s0 = smov 256   ;;  %s1037_s13 = smov 16  }
  0x34   :  { %51 = dma.hbm_to_vmem [thread:$0]  %s1171_s3, 16384, %s46_s18, [#allocation6], %s1036_s0, %s1036_s0, %s1037_s13  }
  0x35   :  { %s1038_s16 = smov [#allocation8]   ;;  %s979_s21 = scalar_lea.hbm %s1173_s5, 4096 }
  0x36   :  { %s59_s17 = sshll.u32 %s1038_s16, 4  ;;  %p980_p10 = scmp.ne.s32.totalorder %s1173_s5, %s979_s21  ;;  %s60_s17 = int_to_ptr.vmem [resolvable:$true] %s59_s17 }
  0x37   :  { %p983_p11 = scmp.lt.u32.totalorder %s979_s21, %s1173_s5 }
  0x39   :  { %p985_p12 = pnand %p983_p11, %p980_p10 }
  0x3b   :  { %988 = shalt.err (!%p985_p12)
}
  0x3c   :  { %s989_s1 = scalar_lea.vmem %s60_s17, 4096  ;;  %p994_p0 = scmp.lt.s32.totalorder %s60_s17, %s60_s17 }
  0x3d   :  { %p990_p13 = scmp.ne.s32.totalorder %s60_s17, %s989_s1  ;;  %p995_p1 = scmp.lt.s32.totalorder %s989_s1, %s989_s1 }
  0x3f   :  { %p996_p2 = por %p995_p1, %p994_p0 }
  0x41   :  { %p997_p3 = pnand %p996_p2, %p990_p13 }
  0x43   :  { %1000 = shalt.err (!%p997_p3)
}
  0x44   :  { %s1039_s3 = smov 128   ;;  %s1040_s18 = smov 8  }
  0x45   :  { %65 = dma.hbm_to_vmem [thread:$0]  %s1173_s5, 4096, %s60_s17, [#allocation9], %s1039_s3, %s1039_s3, %s1040_s18  }
  0x46   :  { %1023 = dma.done.wait [#allocation3], 128  }
  0x47   :  { %1024 = vsyncadd [#allocation3], 4294967168 }
  0x48   :  { %1025 = dma.done.wait [#allocation6], 18432  }
  0x49   :  { %1026 = vsyncadd [#allocation6], 4294948864 }
  0x4a   :  { %1027 = dma.done.wait [#allocation9], 4096  }
  0x4b   :  { %1028 = vsyncadd [#allocation9], 4294963200  ;;  %v1041_v0 = vmov 0.0   ;;  %v82_v1 = vld [vmem:[#allocation5 + $0x8] sm:$0xff]  ;;  %v81_v3 = vld [vmem:[#allocation5] sm:$0xff]  ;;  %vm119_vm0 = vcmask 261120  }
  0x4c   :  { %187 = vmatprep.mubr.f32.mxu0 %v1041_v0  ;;  %v86_v2 = vld [vmem:[#allocation5 + $0x28] sm:$0xff]  ;;  %v85_v5 = vld [vmem:[#allocation5 + $0x20] sm:$0xff]  ;;  %v84_v12 = vld [vmem:[#allocation5 + $0x18] sm:$0xff]  ;;  %s1042_s8 = smov [#allocation10]  }
  0x4d   :  { %v719_v4 = vpack.c.bf16 %v86_v2, %v82_v1  ;;  %v90_v6 = vld [vmem:[#allocation5 + $0x48] sm:$0xff]  ;;  %v721_v8 = vpack.c.bf16 %v85_v5, %v81_v3  ;;  %v89_v10 = vld [vmem:[#allocation5 + $0x40] sm:$0xff]  ;;  %v88_v13 = vld [vmem:[#allocation5 + $0x38] sm:$0xff]  ;;  %s670_s9 = sshll.u32 %s1042_s8, 4  ;;  %s671_s9 = int_to_ptr.vmem [resolvable:$true] %s670_s9 }
  0x4e   :  { %v94_v7 = vld [vmem:[#allocation5 + $0x68] sm:$0xff]  ;;  %v93_v11 = vld [vmem:[#allocation5 + $0x60] sm:$0xff]  ;;  %v83_v15 = vld [vmem:[#allocation5 + $0x10] sm:$0xff]  ;;  %v727_v17 = vpack.c.bf16 %v88_v13, %v84_v12  ;;  %s1001_s10 = scalar_lea.vmem %s671_s9, 128  ;;  %p1006_p5 = scmp.lt.s32.totalorder %s671_s9, %s671_s9 }
  0x4f   :  { %v723_v9 = vpack.c.bf16 %v94_v7, %v90_v6  ;;  %720 = vmatprep.subr.bf16.mxu0 %v719_v4  ;;  %v725_v14 = vpack.c.bf16 %v93_v11, %v89_v10  ;;  %v87_v16 = vld [vmem:[#allocation5 + $0x30] sm:$0xff]  ;;  %v92_v18 = vld [vmem:[#allocation5 + $0x58] sm:$0xff]  ;;  %v270_v20 = vld [vmem:[#allocation7 + $0x8] sm:$0xff]  ;;  %p1002_p4 = scmp.ne.s32.totalorder %s671_s9, %s1001_s10  ;;  %p1007_p6 = scmp.lt.s32.totalorder %s1001_s10, %s1001_s10 }
  0x50   :  { %722 = vmatpush1.bf16.msra.mxu0 %v721_v8  ;;  %v96_v19 = vld [vmem:[#allocation5 + $0x78] sm:$0xff]  ;;  %v269_v23 = vld [vmem:[#allocation7] sm:$0xff]  ;;  %v271_v24 = vld [vmem:[#allocation7 + $0x10] sm:$0xff]  ;;  %v729_v30 = vpack.c.bf16 %v87_v16, %v83_v15 }
  0x51   :  { %724 = vmatprep.subr.bf16.mxu0 %v723_v9  ;;  %v80_v21 = vld [vmem:[#allocation2] sm:$0xff]  ;;  %v737_v26 = vpack.c.bf16 %v271_v24, %v269_v23  ;;  %v274_v27 = vld [vmem:[#allocation7 + $0x28] sm:$0xff]  ;;  %v273_v29 = vld [vmem:[#allocation7 + $0x20] sm:$0xff]  ;;  %v731_v35 = vpack.c.bf16 %v96_v19, %v92_v18  ;;  %p1008_p7 = por %p1007_p6, %p1006_p5 }
  0x52   :  { %v272_v22 = vld [vmem:[#allocation7 + $0x18] sm:$0xff]  ;;  %v275_v32 = vld [vmem:[#allocation7 + $0x30] sm:$0xff]  ;;  %v278_v33 = vld [vmem:[#allocation7 + $0x48] sm:$0xff] }
  0x53   :  { %v735_v25 = vpack.c.bf16 %v272_v22, %v270_v20  ;;  %v276_v28 = vld [vmem:[#allocation7 + $0x38] sm:$0xff]  ;;  %v91_v36 = vld [vmem:[#allocation5 + $0x50] sm:$0xff]  ;;  %v741_v38 = vpack.c.bf16 %v275_v32, %v273_v29  ;;  %v334_v39 = vld [vmem:[#allocation7 + $0x208] sm:$0xff]  ;;  %p1009_p8 = pnand %p1008_p7, %p1002_p4 }
  0x54   :  { %726 = vmatpush1.bf16.msra.mxu0 %v725_v14  ;;  %v739_v31 = vpack.c.bf16 %v276_v28, %v274_v27  ;;  %v280_v34 = vld [vmem:[#allocation7 + $0x58] sm:$0xff]  ;;  %v95_v37 = vld [vmem:[#allocation5 + $0x70] sm:$0xff]  ;;  %v277_v42 = vld [vmem:[#allocation7 + $0x40] sm:$0xff] }
  0x55   :  { %728 = vmatprep.subr.bf16.mxu0 %v727_v17  ;;  %736 = vmatprep.subr.bf16.mxu1 %v735_v25  ;;  %v336_v40 = vld [vmem:[#allocation7 + $0x218] sm:$0xff]  ;;  %v743_v41 = vpack.c.bf16 %v280_v34, %v278_v33  ;;  %v279_v43 = vld [vmem:[#allocation7 + $0x50] sm:$0xff]  ;;  %v733_v44 = vpack.c.bf16 %v95_v37, %v91_v36  ;;  %v282_v45 = vld [vmem:[#allocation7 + $0x68] sm:$0xff] }
  0x56   :  { %738 = vmatpush1.bf16.msra.mxu1 %v737_v26  ;;  %v284_v46 = vld [vmem:[#allocation7 + $0x78] sm:$0xff]  ;;  %v799_v47 = vpack.c.bf16 %v336_v40, %v334_v39  ;;  %v333_v48 = vld [vmem:[#allocation7 + $0x200] sm:$0xff]  ;;  %v335_v49 = vld [vmem:[#allocation7 + $0x210] sm:$0xff]  ;;  %v745_v50 = vpack.c.bf16 %v279_v43, %v277_v42 }
  0x57   :  { %681 = vmatmul.mubr.msk.f32.vlgmr.msra.gmra.mrb[0].mxu0 %vm119_vm0, %v80_v21  ;;  %740 = vmatprep.subr.bf16.mxu1 %v739_v31  ;;  %v338_v51 = vld [vmem:[#allocation7 + $0x228] sm:$0xff]  ;;  %v340_v52 = vld [vmem:[#allocation7 + $0x238] sm:$0xff]  ;;  %v747_v53 = vpack.c.bf16 %v284_v46, %v282_v45  ;;  %v281_v54 = vld [vmem:[#allocation7 + $0x60] sm:$0xff]  ;;  %v801_v56 = vpack.c.bf16 %v335_v49, %v333_v48 }
  0x58   :  { %730 = vmatpush1.bf16.msra.mxu0 %v729_v30  ;;  %258 = vmatprep.mubr.f32.mxu0 %v1041_v0  ;;  %v283_v55 = vld [vmem:[#allocation7 + $0x70] sm:$0xff]  ;;  %v286_v57 = vld [vmem:[#allocation7 + $0x88] sm:$0xff]  ;;  %v288_v58 = vld [vmem:[#allocation7 + $0x98] sm:$0xff]  ;;  %v803_v59 = vpack.c.bf16 %v340_v52, %v338_v51 }
  0x59   :  { %732 = vmatprep.subr.bf16.mxu0 %v731_v35  ;;  %v337_v60 = vld [vmem:[#allocation7 + $0x220] sm:$0xff]  ;;  %v339_v61 = vld [vmem:[#allocation7 + $0x230] sm:$0xff]  ;;  %v749_v62 = vpack.c.bf16 %v283_v55, %v281_v54  ;;  %v342_v63 = vld [vmem:[#allocation7 + $0x248] sm:$0xff]  ;;  %v751_v1 = vpack.c.bf16 %v288_v58, %v286_v57 }
  0x5a   :  { %742 = vmatpush1.bf16.msra.mxu1 %v741_v38  ;;  %v344_v0 = vld [vmem:[#allocation7 + $0x258] sm:$0xff]  ;;  %v285_v2 = vld [vmem:[#allocation7 + $0x80] sm:$0xff]  ;;  %v287_v3 = vld [vmem:[#allocation7 + $0x90] sm:$0xff]  ;;  %v805_v4 = vpack.c.bf16 %v339_v61, %v337_v60 }
  0x5b   :  { %744 = vmatprep.subr.bf16.mxu1 %v743_v41  ;;  %v290_v5 = vld [vmem:[#allocation7 + $0xa8] sm:$0xff]  ;;  %v292_v6 = vld [vmem:[#allocation7 + $0xb8] sm:$0xff]  ;;  %v807_v7 = vpack.c.bf16 %v344_v0, %v342_v63  ;;  %v341_v8 = vld [vmem:[#allocation7 + $0x240] sm:$0xff]  ;;  %v753_v10 = vpack.c.bf16 %v287_v3, %v285_v2 }
  0x5c   :  { %734 = vmatpush1.bf16.msra.mxu0 %v733_v44  ;;  %v343_v9 = vld [vmem:[#allocation7 + $0x250] sm:$0xff]  ;;  %v346_v11 = vld [vmem:[#allocation7 + $0x268] sm:$0xff]  ;;  %v348_v12 = vld [vmem:[#allocation7 + $0x278] sm:$0xff]  ;;  %v755_v13 = vpack.c.bf16 %v292_v6, %v290_v5 }
  0x5d   :  { %800 = vmatprep.subr.bf16.mxu0 %v799_v47  ;;  %v289_v14 = vld [vmem:[#allocation7 + $0xa0] sm:$0xff]  ;;  %v291_v15 = vld [vmem:[#allocation7 + $0xb0] sm:$0xff]  ;;  %v809_v16 = vpack.c.bf16 %v343_v9, %v341_v8  ;;  %v294_v17 = vld [vmem:[#allocation7 + $0xc8] sm:$0xff]  ;;  %v811_v19 = vpack.c.bf16 %v348_v12, %v346_v11 }
  0x5e   :  { %746 = vmatpush1.bf16.msra.mxu1 %v745_v50  ;;  %v296_v18 = vld [vmem:[#allocation7 + $0xd8] sm:$0xff]  ;;  %v345_v20 = vld [vmem:[#allocation7 + $0x260] sm:$0xff]  ;;  %v757_v22 = vpack.c.bf16 %v291_v15, %v289_v14  ;;  %v350_v23 = vld [vmem:[#allocation7 + $0x288] sm:$0xff] }
  0x5f   :  { %682 = vmatmul.mubr.msk.f32.vlgmr.msra.gmra.mrb[2].mxu0 %vm119_vm0, %v80_v21  ;;  %748 = vmatprep.subr.bf16.mxu1 %v747_v53  ;;  %v347_v21 = vld [vmem:[#allocation7 + $0x270] sm:$0xff]  ;;  %v352_v24 = vld [vmem:[#allocation7 + $0x298] sm:$0xff]  ;;  %v759_v25 = vpack.c.bf16 %v296_v18, %v294_v17  ;;  %v293_v26 = vld [vmem:[#allocation7 + $0xc0] sm:$0xff] }
  0x60   :  { %802 = vmatpush1.bf16.msra.mxu0 %v801_v56  ;;  %v295_v27 = vld [vmem:[#allocation7 + $0xd0] sm:$0xff]  ;;  %v813_v28 = vpack.c.bf16 %v347_v21, %v345_v20  ;;  %v298_v29 = vld [vmem:[#allocation7 + $0xe8] sm:$0xff]  ;;  %v300_v30 = vld [vmem:[#allocation7 + $0xf8] sm:$0xff]  ;;  %v815_v31 = vpack.c.bf16 %v352_v24, %v350_v23 }
  0x61   :  { %804 = vmatprep.subr.bf16.mxu0 %v803_v59  ;;  %v349_v32 = vld [vmem:[#allocation7 + $0x280] sm:$0xff]  ;;  %v351_v33 = vld [vmem:[#allocation7 + $0x290] sm:$0xff]  ;;  %v761_v34 = vpack.c.bf16 %v295_v27, %v293_v26  ;;  %v354_v35 = vld [vmem:[#allocation7 + $0x2a8] sm:$0xff]  ;;  %v763_v37 = vpack.c.bf16 %v300_v30, %v298_v29 }
  0x62   :  { %750 = vmatpush1.bf16.msra.mxu1 %v749_v62  ;;  %v356_v36 = vld [vmem:[#allocation7 + $0x2b8] sm:$0xff]  ;;  %v297_v38 = vld [vmem:[#allocation7 + $0xe0] sm:$0xff]  ;;  %v299_v39 = vld [vmem:[#allocation7 + $0xf0] sm:$0xff]  ;;  %v817_v40 = vpack.c.bf16 %v351_v33, %v349_v32 }
  0x63   :  { %752 = vmatprep.subr.bf16.mxu1 %v751_v1  ;;  %v302_v41 = vld [vmem:[#allocation7 + $0x108] sm:$0xff]  ;;  %v304_v42 = vld [vmem:[#allocation7 + $0x118] sm:$0xff]  ;;  %v819_v43 = vpack.c.bf16 %v356_v36, %v354_v35  ;;  %v353_v44 = vld [vmem:[#allocation7 + $0x2a0] sm:$0xff]  ;;  %v765_v46 = vpack.c.bf16 %v299_v39, %v297_v38 }
  0x64   :  { %806 = vmatpush1.bf16.msra.mxu0 %v805_v4  ;;  %v355_v45 = vld [vmem:[#allocation7 + $0x2b0] sm:$0xff]  ;;  %v358_v47 = vld [vmem:[#allocation7 + $0x2c8] sm:$0xff]  ;;  %v360_v48 = vld [vmem:[#allocation7 + $0x2d8] sm:$0xff]  ;;  %v767_v49 = vpack.c.bf16 %v304_v42, %v302_v41 }
  0x65   :  { %808 = vmatprep.subr.bf16.mxu0 %v807_v7  ;;  %v301_v50 = vld [vmem:[#allocation7 + $0x100] sm:$0xff]  ;;  %v303_v51 = vld [vmem:[#allocation7 + $0x110] sm:$0xff]  ;;  %v821_v52 = vpack.c.bf16 %v355_v45, %v353_v44  ;;  %v306_v53 = vld [vmem:[#allocation7 + $0x128] sm:$0xff]  ;;  %v823_v55 = vpack.c.bf16 %v360_v48, %v358_v47 }
  0x66   :  { %754 = vmatpush1.bf16.msra.mxu1 %v753_v10  ;;  %v308_v54 = vld [vmem:[#allocation7 + $0x138] sm:$0xff]  ;;  %v357_v56 = vld [vmem:[#allocation7 + $0x2c0] sm:$0xff]  ;;  %v359_v57 = vld [vmem:[#allocation7 + $0x2d0] sm:$0xff]  ;;  %v769_v58 = vpack.c.bf16 %v303_v51, %v301_v50 }
  0x67   :  { %756 = vmatprep.subr.bf16.mxu1 %v755_v13  ;;  %v362_v59 = vld [vmem:[#allocation7 + $0x2e8] sm:$0xff]  ;;  %v364_v60 = vld [vmem:[#allocation7 + $0x2f8] sm:$0xff]  ;;  %v771_v61 = vpack.c.bf16 %v308_v54, %v306_v53  ;;  %v305_v62 = vld [vmem:[#allocation7 + $0x120] sm:$0xff]  ;;  %v825_v0 = vpack.c.bf16 %v359_v57, %v357_v56 }
  0x68   :  { %810 = vmatpush1.bf16.msra.mxu0 %v809_v16  ;;  %v307_v63 = vld [vmem:[#allocation7 + $0x130] sm:$0xff]  ;;  %v310_v1 = vld [vmem:[#allocation7 + $0x148] sm:$0xff]  ;;  %v312_v2 = vld [vmem:[#allocation7 + $0x158] sm:$0xff]  ;;  %v827_v3 = vpack.c.bf16 %v364_v60, %v362_v59 }
  0x69   :  { %812 = vmatprep.subr.bf16.mxu0 %v811_v19  ;;  %v361_v4 = vld [vmem:[#allocation7 + $0x2e0] sm:$0xff]  ;;  %v363_v5 = vld [vmem:[#allocation7 + $0x2f0] sm:$0xff]  ;;  %v773_v6 = vpack.c.bf16 %v307_v63, %v305_v62  ;;  %v366_v7 = vld [vmem:[#allocation7 + $0x308] sm:$0xff]  ;;  %v775_v9 = vpack.c.bf16 %v312_v2, %v310_v1 }
  0x6a   :  { %758 = vmatpush1.bf16.msra.mxu1 %v757_v22  ;;  %v368_v8 = vld [vmem:[#allocation7 + $0x318] sm:$0xff]  ;;  %v309_v10 = vld [vmem:[#allocation7 + $0x140] sm:$0xff]  ;;  %v311_v11 = vld [vmem:[#allocation7 + $0x150] sm:$0xff]  ;;  %v829_v12 = vpack.c.bf16 %v363_v5, %v361_v4 }
  0x6b   :  { %760 = vmatprep.subr.bf16.mxu1 %v759_v25  ;;  %v314_v13 = vld [vmem:[#allocation7 + $0x168] sm:$0xff]  ;;  %v316_v14 = vld [vmem:[#allocation7 + $0x178] sm:$0xff]  ;;  %v831_v15 = vpack.c.bf16 %v368_v8, %v366_v7  ;;  %v365_v16 = vld [vmem:[#allocation7 + $0x300] sm:$0xff]  ;;  %v777_v18 = vpack.c.bf16 %v311_v11, %v309_v10 }
  0x6c   :  { %814 = vmatpush1.bf16.msra.mxu0 %v813_v28  ;;  %v367_v17 = vld [vmem:[#allocation7 + $0x310] sm:$0xff]  ;;  %v370_v19 = vld [vmem:[#allocation7 + $0x328] sm:$0xff]  ;;  %v372_v20 = vld [vmem:[#allocation7 + $0x338] sm:$0xff]  ;;  %v779_v21 = vpack.c.bf16 %v316_v14, %v314_v13 }
  0x6d   :  { %816 = vmatprep.subr.bf16.mxu0 %v815_v31  ;;  %v313_v22 = vld [vmem:[#allocation7 + $0x160] sm:$0xff]  ;;  %v315_v23 = vld [vmem:[#allocation7 + $0x170] sm:$0xff]  ;;  %v833_v24 = vpack.c.bf16 %v367_v17, %v365_v16  ;;  %v318_v25 = vld [vmem:[#allocation7 + $0x188] sm:$0xff]  ;;  %v835_v27 = vpack.c.bf16 %v372_v20, %v370_v19 }
  0x6e   :  { %762 = vmatpush1.bf16.msra.mxu1 %v761_v34  ;;  %v320_v26 = vld [vmem:[#allocation7 + $0x198] sm:$0xff]  ;;  %v369_v28 = vld [vmem:[#allocation7 + $0x320] sm:$0xff]  ;;  %v371_v29 = vld [vmem:[#allocation7 + $0x330] sm:$0xff]  ;;  %v781_v30 = vpack.c.bf16 %v315_v23, %v313_v22 }
  0x6f   :  { %764 = vmatprep.subr.bf16.mxu1 %v763_v37  ;;  %v374_v31 = vld [vmem:[#allocation7 + $0x348] sm:$0xff]  ;;  %v376_v32 = vld [vmem:[#allocation7 + $0x358] sm:$0xff]  ;;  %v783_v33 = vpack.c.bf16 %v320_v26, %v318_v25  ;;  %v317_v34 = vld [vmem:[#allocation7 + $0x180] sm:$0xff]  ;;  %v837_v36 = vpack.c.bf16 %v371_v29, %v369_v28  ;;  %v99_v29 = vlaneseq }
  0x70   :  { %818 = vmatpush1.bf16.msra.mxu0 %v817_v40  ;;  %v319_v35 = vld [vmem:[#allocation7 + $0x190] sm:$0xff]  ;;  %v322_v37 = vld [vmem:[#allocation7 + $0x1a8] sm:$0xff]  ;;  %v324_v38 = vld [vmem:[#allocation7 + $0x1b8] sm:$0xff]  ;;  %v839_v39 = vpack.c.bf16 %v376_v32, %v374_v31 }
  0x71   :  { %820 = vmatprep.subr.bf16.mxu0 %v819_v43  ;;  %v373_v40 = vld [vmem:[#allocation7 + $0x340] sm:$0xff]  ;;  %v375_v41 = vld [vmem:[#allocation7 + $0x350] sm:$0xff]  ;;  %v785_v42 = vpack.c.bf16 %v319_v35, %v317_v34  ;;  %v378_v43 = vld [vmem:[#allocation7 + $0x368] sm:$0xff]  ;;  %v787_v45 = vpack.c.bf16 %v324_v38, %v322_v37 }
  0x72   :  { %766 = vmatpush1.bf16.msra.mxu1 %v765_v46  ;;  %v380_v44 = vld [vmem:[#allocation7 + $0x378] sm:$0xff]  ;;  %v321_v46 = vld [vmem:[#allocation7 + $0x1a0] sm:$0xff]  ;;  %v323_v47 = vld [vmem:[#allocation7 + $0x1b0] sm:$0xff]  ;;  %v841_v48 = vpack.c.bf16 %v375_v41, %v373_v40 }
  0x73   :  { %768 = vmatprep.subr.bf16.mxu1 %v767_v49  ;;  %v326_v49 = vld [vmem:[#allocation7 + $0x1c8] sm:$0xff]  ;;  %v328_v50 = vld [vmem:[#allocation7 + $0x1d8] sm:$0xff]  ;;  %v843_v51 = vpack.c.bf16 %v380_v44, %v378_v43  ;;  %v379_v53 = vld [vmem:[#allocation7 + $0x370] sm:$0xff]  ;;  %v789_v54 = vpack.c.bf16 %v323_v47, %v321_v46 }
  0x74   :  { %822 = vmatpush1.bf16.msra.mxu0 %v821_v52  ;;  %v377_v52 = vld [vmem:[#allocation7 + $0x360] sm:$0xff]  ;;  %v384_v56 = vld [vmem:[#allocation7 + $0x398] sm:$0xff]  ;;  %v791_v57 = vpack.c.bf16 %v328_v50, %v326_v49  ;;  %v330_v2 = vld [vmem:[#allocation7 + $0x1e8] sm:$0xff] }
  0x75   :  { %824 = vmatprep.subr.bf16.mxu0 %v823_v55  ;;  %v382_v55 = vld [vmem:[#allocation7 + $0x388] sm:$0xff]  ;;  %v325_v60 = vld [vmem:[#allocation7 + $0x1c0] sm:$0xff]  ;;  %v331_v8 = vld [vmem:[#allocation7 + $0x1f0] sm:$0xff] }
  0x76   :  { %770 = vmatpush1.bf16.msra.mxu1 %v769_v58  ;;  %v845_v58 = vpack.c.bf16 %v379_v53, %v377_v52  ;;  %v847_v59 = vpack.c.bf16 %v384_v56, %v382_v55  ;;  %v381_v62 = vld [vmem:[#allocation7 + $0x380] sm:$0xff]  ;;  %v386_v4 = vld [vmem:[#allocation7 + $0x3a8] sm:$0xff]  ;;  %v97_v32 = vld [vmem:[%s1170_s2] sm:$0xf] }
  0x77   :  { %772 = vmatprep.subr.bf16.mxu1 %v771_v61  ;;  %v327_v61 = vld [vmem:[#allocation7 + $0x1d0] sm:$0xff]  ;;  %v329_v7 = vld [vmem:[#allocation7 + $0x1e0] sm:$0xff]  ;;  %v390_v14 = vld [vmem:[#allocation7 + $0x3c8] sm:$0xff] }
  0x78   :  { %826 = vmatpush1.bf16.msra.mxu0 %v825_v0  ;;  %v793_v63 = vpack.c.bf16 %v327_v61, %v325_v60  ;;  %v383_v0 = vld [vmem:[#allocation7 + $0x390] sm:$0xff]  ;;  %v797_v10 = vpack.c.bf16 %v331_v8, %v329_v7  ;;  %v385_v11 = vld [vmem:[#allocation7 + $0x3a0] sm:$0xff]  ;;  %v394_v20 = vld [vmem:[#allocation7 + $0x3e8] sm:$0xff] }
  0x79   :  { %828 = vmatprep.subr.bf16.mxu0 %v827_v3  ;;  %v849_v1 = vpack.c.bf16 %v383_v0, %v381_v62  ;;  %v332_v3 = vld [vmem:[#allocation7 + $0x1f8] sm:$0xff]  ;;  %v389_v17 = vld [vmem:[#allocation7 + $0x3c0] sm:$0xff]  ;;  %v554_v41 = vld [vmem:[#allocation8 + $0x8] sm:$0xff] }
  0x7a   :  { %774 = vmatpush1.bf16.msra.mxu1 %v773_v6  ;;  %v795_v5 = vpack.c.bf16 %v332_v3, %v330_v2  ;;  %v388_v6 = vld [vmem:[#allocation7 + $0x3b8] sm:$0xff]  ;;  %v393_v23 = vld [vmem:[#allocation7 + $0x3e0] sm:$0xff]  ;;  %v571_v44 = vld [vmem:[#allocation8 + $0x90] sm:$0xff] }
  0x7b   :  { %776 = vmatprep.subr.bf16.mxu1 %v775_v9  ;;  %v851_v9 = vpack.c.bf16 %v388_v6, %v386_v4  ;;  %v569_v26 = vld [vmem:[#allocation8 + $0x80] sm:$0xff]  ;;  %v556_v52 = vld [vmem:[#allocation8 + $0x18] sm:$0xff]  ;;  %v574_v55 = vld [vmem:[#allocation8 + $0xa8] sm:$0xff] }
  0x7c   :  { %830 = vmatpush1.bf16.msra.mxu0 %v829_v12  ;;  %v387_v12 = vld [vmem:[#allocation7 + $0x3b0] sm:$0xff]  ;;  %v553_v40 = vld [vmem:[#allocation8] sm:$0xff]  ;;  %v558_v62 = vld [vmem:[#allocation8 + $0x28] sm:$0xff] }
  0x7d   :  { %832 = vmatprep.subr.bf16.mxu0 %v831_v15  ;;  %v853_v13 = vpack.c.bf16 %v387_v12, %v385_v11  ;;  %v392_v15 = vld [vmem:[#allocation7 + $0x3d8] sm:$0xff]  ;;  %v557_v61 = vld [vmem:[#allocation8 + $0x20] sm:$0xff]  ;;  %v575_v0 = vld [vmem:[#allocation8 + $0xb0] sm:$0xff] }
  0x7e   :  { %778 = vmatpush1.bf16.msra.mxu1 %v777_v18  ;;  %v855_v16 = vpack.c.bf16 %v392_v15, %v390_v14  ;;  %v391_v18 = vld [vmem:[#allocation7 + $0x3d0] sm:$0xff]  ;;  %v873_v3 = vpack.c.bf16 %v558_v62, %v557_v61  ;;  %v560_v7 = vld [vmem:[#allocation8 + $0x38] sm:$0xff]  ;;  %v577_v8 = vld [vmem:[#allocation8 + $0xc0] sm:$0xff] }
  0x7f   :  { %780 = vmatprep.subr.bf16.mxu1 %v779_v21  ;;  %v857_v19 = vpack.c.bf16 %v391_v18, %v389_v17  ;;  %v396_v21 = vld [vmem:[#allocation7 + $0x3f8] sm:$0xff]  ;;  %v559_v6 = vld [vmem:[#allocation8 + $0x30] sm:$0xff]  ;;  %v561_v12 = vld [vmem:[#allocation8 + $0x40] sm:$0xff] }
  0x80   :  { %834 = vmatpush1.bf16.msra.mxu0 %v833_v24  ;;  %v859_v22 = vpack.c.bf16 %v396_v21, %v394_v20  ;;  %v395_v24 = vld [vmem:[#allocation7 + $0x3f0] sm:$0xff]  ;;  %v581_v21 = vld [vmem:[#allocation8 + $0xe0] sm:$0xff] }
  0x81   :  { %836 = vmatprep.subr.bf16.mxu0 %v835_v27  ;;  %v861_v25 = vpack.c.bf16 %v395_v24, %v393_v23  ;;  %v570_v27 = vld [vmem:[#allocation8 + $0x88] sm:$0xff]  ;;  %v579_v15 = vld [vmem:[#allocation8 + $0xd0] sm:$0xff]  ;;  %v565_v24 = vld [vmem:[#allocation8 + $0x60] sm:$0xff] }
  0x82   :  { %782 = vmatpush1.bf16.msra.mxu1 %v781_v30  ;;  %v863_v28 = vpack.c.bf16 %v570_v27, %v569_v26  ;;  %v1133_v30 = vshrl.u32 %v99_v29, 7  ;;  %v563_v18 = vld [vmem:[#allocation8 + $0x50] sm:$0xff] }
  0x83   :  { %784 = vmatprep.subr.bf16.mxu1 %v783_v33  ;;  %v583_v27 = vld [vmem:[#allocation8 + $0xf0] sm:$0xff] }
  0x84   :  { %838 = vmatpush1.bf16.msra.mxu0 %v837_v36  ;;  %v101_v31 = vsub.s32 0, %v1133_v30  ;;  %v105_v33 = vsub.s32 1, %v1133_v30  ;;  %v113_v43 = vsub.s32 3, %v1133_v30 }
  0x85   :  { %840 = vmatprep.subr.bf16.mxu0 %v839_v39  ;;  %v109_v39 = vsub.s32 2, %v1133_v30 }
  0x86   :  { %786 = vmatpush1.bf16.msra.mxu1 %v785_v42  ;;  %v102_v34 = vrot.slane %v97_v32, %v101_v31  ;;  %v106_v35 = vrot.slane %v97_v32, %v105_v33  ;;  %v114_v53 = vrot.slane %v97_v32, %v113_v43 }
  0x87   :  { %788 = vmatprep.subr.bf16.mxu1 %v787_v45  ;;  %v572_v45 = vld [vmem:[#allocation8 + $0x98] sm:$0xff]  ;;  %v110_v49 = vrot.slane %v97_v32, %v109_v39  ;;  %v567_v32 = vld [vmem:[#allocation8 + $0x70] sm:$0xff] }
  0x88   :  { %842 = vmatpush1.bf16.msra.mxu0 %v841_v48  ;;  %v865_v48 = vpack.c.bf16 %v554_v41, %v553_v40  ;;  %v867_v50 = vpack.c.bf16 %v572_v45, %v571_v44 }
  0x89   :  { %844 = vmatprep.subr.bf16.mxu0 %v843_v51  ;;  %v555_v51 = vld [vmem:[#allocation8 + $0x10] sm:$0xff] }
  0x8a   :  { %790 = vmatpush1.bf16.msra.mxu1 %v789_v54  ;;  %v573_v54 = vld [vmem:[#allocation8 + $0xa0] sm:$0xff] }
  0x8b   :  { %792 = vmatprep.subr.bf16.mxu1 %v791_v57  ;;  %v869_v57 = vpack.c.bf16 %v556_v52, %v555_v51  ;;  %v871_v60 = vpack.c.bf16 %v574_v55, %v573_v54 }
  0x8c   :  { %846 = vmatpush1.bf16.msra.mxu0 %v845_v58 }
  0x8d   :  { %848 = vmatprep.subr.bf16.mxu0 %v847_v59 }
  0x8e   :  { %794 = vmatpush1.bf16.msra.mxu1 %v793_v63 }
  0x8f   :  { %796 = vmatprep.subr.bf16.mxu1 %v795_v5 }
  0x90   :  { %850 = vmatpush1.bf16.msra.mxu0 %v849_v1  ;;  %v576_v1 = vld [vmem:[#allocation8 + $0xb8] sm:$0xff] }
  0x91   :  { %852 = vmatprep.subr.bf16.mxu0 %v851_v9  ;;  %v875_v5 = vpack.c.bf16 %v576_v1, %v575_v0  ;;  %v578_v9 = vld [vmem:[#allocation8 + $0xc8] sm:$0xff] }
  0x92   :  { %798 = vmatpush1.bf16.msra.mxu1 %v797_v10  ;;  %v877_v10 = vpack.c.bf16 %v560_v7, %v559_v6  ;;  %v879_v11 = vpack.c.bf16 %v578_v9, %v577_v8 }
  0x93   :  { %864 = vmatprep.subr.bf16.mxu1 %v863_v28  ;;  %v584_v28 = vld [vmem:[#allocation8 + $0xf8] sm:$0xff] }
  0x94   :  { %854 = vmatpush1.bf16.msra.mxu0 %v853_v13  ;;  %v562_v13 = vld [vmem:[#allocation8 + $0x48] sm:$0xff]  ;;  %v891_v29 = vpack.c.bf16 %v584_v28, %v583_v27 }
  0x95   :  { %856 = vmatprep.subr.bf16.mxu0 %v855_v16  ;;  %v881_v14 = vpack.c.bf16 %v562_v13, %v561_v12  ;;  %v580_v16 = vld [vmem:[#allocation8 + $0xd8] sm:$0xff] }
  0x96   :  { %v883_v17 = vpack.c.bf16 %v580_v16, %v579_v15 }
  0x98   :  { %858 = vmatpush1.bf16.msra.mxu0 %v857_v19  ;;  %v564_v19 = vld [vmem:[#allocation8 + $0x58] sm:$0xff] }
  0x99   :  { %860 = vmatprep.subr.bf16.mxu0 %v859_v22  ;;  %v885_v20 = vpack.c.bf16 %v564_v19, %v563_v18  ;;  %v582_v22 = vld [vmem:[#allocation8 + $0xe8] sm:$0xff] }
  0x9a   :  { %v887_v23 = vpack.c.bf16 %v582_v22, %v581_v21 }
  0x9c   :  { %862 = vmatpush1.bf16.msra.mxu0 %v861_v25  ;;  %v566_v25 = vld [vmem:[#allocation8 + $0x68] sm:$0xff] }
  0x9d   :  { %v889_v26 = vpack.c.bf16 %v566_v25, %v565_v24 }
 0x12a   :  { %v189_v36 = vpop.f32.mrb[0].mxu0 }
 0x12b   :  { %v190_v37 = vadd.f32 %v189_v36, %v102_v34  ;;  %v191_v38 = vpop.f32.mrb[1].mxu0  ;;  %v568_v34 = vld [vmem:[#allocation8 + $0x78] sm:$0xff] }
 0x12c   :  { %v192_v42 = vadd.f32 %v191_v38, %v106_v35  ;;  %v893_v35 = vpack.c.bf16 %v568_v34, %v567_v32  ;;  %v397_v36 = vld [vmem:[%s1172_s4] sm:$0x3] }
 0x12d   :  { %v265_v46 = vmax.f32 %v190_v37, 0.0  ;;  %v402_v39 = vrot.slane %v397_v36, %v101_v31  ;;  %v406_v40 = vrot.slane %v397_v36, %v105_v33 }
 0x12e   :  { %v266_v47 = vmax.f32 %v192_v42, 0.0 }
 0x130   :  { %473 = vmatprep.mubr.f32.mxu1 %v266_v47 }
 0x131   :  { %474 = vmatmul.mubr.f32.vlgmr.msra.gmra.mrb[0].mxu1 %v265_v46 }
 0x132   :  { %v260_v56 = vpop.f32.mrb[2].mxu0  ;;  %866 = vmatpush3.bf16.msra.mxu1 %v865_v48 }
 0x133   :  { %v261_v58 = vadd.f32 %v260_v56, %v110_v49  ;;  %v262_v59 = vpop.f32.mrb[3].mxu0  ;;  %868 = vmatprep.subr.bf16.mxu1 %v867_v50  ;;  %v683_v50 = vld [vmem:[%s1174_s6] ss:$0 sm:$0xff] }
 0x134   :  { %v263_v63 = vadd.f32 %v262_v59, %v114_v53 }
 0x135   :  { %v267_v4 = vmax.f32 %v261_v58, 0.0 }
 0x136   :  { %v268_v2 = vmax.f32 %v263_v63, 0.0  ;;  %870 = vmatpush3.bf16.msra.mxu1 %v869_v57 }
 0x137   :  { %872 = vmatprep.subr.bf16.mxu1 %v871_v60 }
 0x138   :  { %544 = vmatprep.mubr.f32.mxu0 %v268_v2 }
 0x139   :  { %545 = vmatmul.mubr.f32.vlgmr.msra.gmra.mrb[4].mxu0 %v267_v4 }
 0x13a   :  { %874 = vmatpush3.bf16.msra.mxu1 %v873_v3 }
 0x13b   :  { %876 = vmatprep.subr.bf16.mxu1 %v875_v5 }
 0x13e   :  { %878 = vmatpush3.bf16.msra.mxu1 %v877_v10 }
 0x13f   :  { %880 = vmatprep.subr.bf16.mxu1 %v879_v11 }
 0x142   :  { %882 = vmatpush3.bf16.msra.mxu1 %v881_v14 }
 0x143   :  { %884 = vmatprep.subr.bf16.mxu1 %v883_v17 }
 0x146   :  { %886 = vmatpush3.bf16.msra.mxu1 %v885_v20 }
 0x147   :  { %888 = vmatprep.subr.bf16.mxu1 %v887_v23 }
 0x14a   :  { %890 = vmatpush3.bf16.msra.mxu1 %v889_v26 }
 0x14b   :  { %892 = vmatprep.subr.bf16.mxu1 %v891_v29 }
 0x14e   :  { %894 = vmatpush3.bf16.msra.mxu1 %v893_v35 }
 0x204   :  { %v475_v37 = vpop.f32.mrb[0].mxu1 }
 0x205   :  { %v477_v38 = vpop.f32.mrb[1].mxu1  ;;  %v476_v41 = vadd.f32 %v475_v37, %v402_v39 }
 0x206   :  { %v478_v42 = vadd.f32 %v477_v38, %v406_v40 }
 0x20c   :  { %v546_v43 = vpop.f32.mrb[4].mxu0 }
 0x20d   :  { %v547_v44 = vadd.f32 %v546_v43, %v476_v41  ;;  %v548_v45 = vpop.f32.mrb[5].mxu0 }
 0x20e   :  { %v549_v46 = vadd.f32 %v548_v45, %v478_v42 }
 0x20f   :  { %v551_v48 = vmax.f32 %v547_v44, 0.0 }
 0x210   :  { %v552_v47 = vmax.f32 %v549_v46, 0.0 }
 0x212   :  { %656 = vmatprep.mubr.f32.mxu1 %v552_v47 }
 0x213   :  { %657 = vmatmul.mubr.f32.vlgmr.msra.gmra.mrb[2].mxu1 %v551_v48 }
 0x2e6   :  { %v716_v49 = vpop.f32.mrb[2].mxu1 }
 0x2e7   :  { %v717_v51 = vpop.f32.mrb[3].mxu1 }
 0x2e8   :  { %v718_v31 = vadd.f32 %v717_v51, %v716_v49 }
 0x2ea   :  { %v659_v52 = vadd.f32 %v718_v31, %v683_v50 }
 0x2ec   :  { %911 = vtanh.f32 %v659_v52 }
 0x2f6   :  { %v912_v30 = vpop.eup %911 }
 0x2f7   :  { %663 = vst [vmem:[#allocation10] sm:$0xff] %v912_v30 }
 0x2f8   :  { %1012 = shalt.err (!%p1009_p8)
}
 0x2f9   :  { %s1013_s6 = scalar_lea.hbm %s1175_s7, 128 }
 0x2fa   :  { %p1014_p9 = scmp.ne.s32.totalorder %s1175_s7, %s1013_s6  ;;  %p1017_p10 = scmp.lt.u32.totalorder %s1013_s6, %s1175_s7 }
 0x2fc   :  { %p1019_p11 = pnand %p1017_p10, %p1014_p9 }
 0x2fe   :  { %1022 = shalt.err (!%p1019_p11)
}
 0x2ff   :  { %673 = dma.vmem_to_hbm [thread:$0]  %s671_s9, 128, %s1175_s7, [#allocation4]  }
 0x300   :  { %1029 = dma.done.wait [#allocation4], 128  }
 0x301   :  { %1030 = vsyncadd [#allocation4], 4294967168 }
 0x302   :  { %677 = vsyncpa [#allocation3], 1 }
 0x303   :  { %678 = vsyncpa [#allocation6], 1 }
 0x304   :  { %679 = vsyncpa [#allocation9], 1 }
 0x305   :  { %680 = vsyncpa [#allocation4], 1 }

</bundles_post_ra>
